<compile_context>
chip_gen: v6e
topology: v6e:2x2x1
jax: 0.10.0
libtpu: 0.0.40
codegen_flags: <defaults>
</compile_context>

<pallas_src>
import functools

import jax
import jax.numpy as jnp
from jax.experimental import pallas as pl
from jax.experimental.pallas import tpu as pltpu


def _up_kernel(x_ref, w_ref, b_ref, o_ref, *, neg_slope):
    # x_ref: (1, rows, Cin)   w_ref: (Cin, 4*Cout)   b_ref: (1, 4*Cout)
    # o_ref: (1, rows, 4*Cout)
    y = jnp.dot(x_ref[0], w_ref[...], preferred_element_type=jnp.float32)
    y = y + b_ref[...]                      # folded BN shift (broadcast 1 x N)
    y = jnp.where(y >= 0.0, y, neg_slope * y)   # LeakyReLU(0.1)
    o_ref[0] = y.astype(o_ref.dtype)


def _pick_row_tile(H, W, bytes_per_row, budget_bytes=4 << 20):
    """Largest divisor TH of H whose (TH*W)-row block fits the VMEM budget.

    No halo is needed (stride == kernel), so row tiles are independent.
    TH*W must be a multiple of 8 (sublane) unless it is the full H*W extent.
    """
    best = 1
    for th in range(1, H + 1):
        if H % th:
            continue
        rows = th * W
        if rows % 8 != 0 and th != H:
            continue
        if rows * bytes_per_row <= budget_bytes:
            best = th
    return best


def up_forward(x, w_pt, gamma, beta, running_mean, running_var,
               eps=1e-5, negative_slope=0.1):
    """Up module forward.

    x:     (B, H, W, Cin)  NHWC activations (PyTorch NCHW transposed)
    w_pt:  (Cin, Cout, 2, 2)  PyTorch ConvTranspose2d weight layout
    gamma, beta, running_mean, running_var: (Cout,) BatchNorm2d (eval mode)
    returns (B, 2H, 2W, Cout) NHWC.
    """
    B, H, W, Cin = x.shape
    Cin_w, Cout, kH, kW = w_pt.shape
    assert Cin_w == Cin and (kH, kW) == (2, 2)
    N = 4 * Cout

    # Fold eval-mode BatchNorm into the matmul weight / bias.
    scale = gamma / jnp.sqrt(running_var + eps)            # (Cout,)
    shift = beta - running_mean * scale                    # (Cout,)
    # (Cin, Cout, 2, 2) -> (Cin, 2, 2, Cout) -> scaled -> (Cin, 4*Cout)
    w2 = (jnp.transpose(w_pt, (0, 2, 3, 1)) * scale).reshape(Cin, N)
    b2 = jnp.tile(shift, 4).reshape(1, N)                  # per (dy,dx,co)

    x_flat = x.reshape(B, H * W, Cin)                      # contiguous, free

    # Row tiling: grid = (B, H // TH); double-buffered in+out block bytes/row.
    bytes_per_row = 4 * (Cin + N) * 2
    TH = _pick_row_tile(H, W, bytes_per_row)
    rows = TH * W
    grid = (B, H // TH)

    x_blk = rows * Cin * 4
    o_blk = rows * N * 4
    w_bytes = (Cin * N + N) * 4
    vmem_limit = int(min(max(2 * (x_blk + o_blk) + w_bytes + (1 << 20),
                             4 << 20), 32 << 20))

    out_flat = pl.pallas_call(
        functools.partial(_up_kernel, neg_slope=negative_slope),
        out_shape=jax.ShapeDtypeStruct((B, H * W, N), x.dtype),
        grid_spec=pltpu.PrefetchScalarGridSpec(
            num_scalar_prefetch=0,
            grid=grid,
            in_specs=[
                pl.BlockSpec((1, rows, Cin), lambda b, t: (b, t, 0)),
                pl.BlockSpec((Cin, N), lambda b, t: (0, 0)),
                pl.BlockSpec((1, N), lambda b, t: (0, 0)),
            ],
            out_specs=pl.BlockSpec((1, rows, N), lambda b, t: (b, t, 0)),
        ),
        compiler_params=pltpu.CompilerParams(
            dimension_semantics=("parallel", "parallel"),
            vmem_limit_bytes=vmem_limit),
    )(x_flat, w2, b2)

    # Pixel-shuffle layout plumbing (outside the kernel):
    # (B, H*W, 2*2*Cout) -> (B, H, 2, W, 2, Cout) -> (B, 2H, 2W, Cout)
    out = out_flat.reshape(B, H, W, 2, 2, Cout)
    out = jnp.transpose(out, (0, 1, 3, 2, 4, 5))
    return out.reshape(B, 2 * H, 2 * W, Cout)


def _ref_forward(x, w_pt, gamma, beta, running_mean, running_var,
                 eps=1e-5, negative_slope=0.1):
    """Pure-JAX reference (PyTorch Up forward in eval mode, NHWC)."""
    Cin, Cout, kH, kW = w_pt.shape
    # ConvTranspose2d(stride=2, pad=0) == conv of the zero-dilated input with
    # the spatially-flipped kernel, edge padding k-1 on each side.
    w_flip = w_pt[:, :, ::-1, ::-1]                        # (Cin, Cout, 2, 2)
    w_hwio = jnp.transpose(w_flip, (2, 3, 0, 1))           # (kH, kW, Cin, Cout)
    y = jax.lax.conv_general_dilated(
        x, w_hwio, window_strides=(1, 1),
        padding=[(kH - 1, kH - 1), (kW - 1, kW - 1)],
        lhs_dilation=(2, 2),
        dimension_numbers=("NHWC", "HWIO", "NHWC"))
    y = (y - running_mean) / jnp.sqrt(running_var + eps) * gamma + beta
    # Dropout2d(dp=0) / eval is identity.
    return jnp.where(y >= 0, y, negative_slope * y)


if __name__ == "__main__":
    B, Cin, Cout, H, W = 2, 64, 32, 16, 16     # 4*Cout = 128 -> lane-dense out

    key = jax.random.PRNGKey(0)
    keys = jax.random.split(key, 6)

    x = jax.random.normal(keys[0], (B, H, W, Cin), jnp.float32)
    w_pt = jax.random.normal(keys[1], (Cin, Cout, 2, 2), jnp.float32) * 0.1
    gamma = 1.0 + 0.1 * jax.random.normal(keys[2], (Cout,), jnp.float32)
    beta = 0.1 * jax.random.normal(keys[3], (Cout,), jnp.float32)
    running_mean = 0.1 * jax.random.normal(keys[4], (Cout,), jnp.float32)
    running_var = 1.0 + 0.1 * jnp.abs(
        jax.random.normal(keys[5], (Cout,), jnp.float32))

    out = up_forward(x, w_pt, gamma, beta, running_mean, running_var)
    out = jax.block_until_ready(out)

    ref = _ref_forward(x, w_pt, gamma, beta, running_mean, running_var)
    err = float(jnp.max(jnp.abs(out - ref)))
    assert out.shape == (B, 2 * H, 2 * W, Cout), out.shape
    assert jnp.allclose(out, ref, atol=1e-4, rtol=1e-4), f"max abs err {err}"
    print("KERNEL_OK")
</pallas_src>

<mosaic_0001>
module attributes {stable_mosaic.version = 11 : i64} {
  func.func @_up_kernel(%arg0: i32, %arg1: i32, %arg2: memref<1x256x64xf32, #tpu.memory_space<vmem>>, %arg3: memref<64x128xf32, #tpu.memory_space<vmem>>, %arg4: memref<1x128xf32, #tpu.memory_space<vmem>>, %arg5: memref<1x256x128xf32, #tpu.memory_space<vmem>>) attributes {dimension_semantics = [#tpu.dimension_semantics<parallel>, #tpu.dimension_semantics<parallel>], iteration_bounds = array<i64: 2, 1>, scalar_prefetch = 0 : i64, scratch_operands = 0 : i64, tpu.core_type = #tpu.core_type<tc>, window_params = [{transform_indices = @transform_0, window_bounds = array<i64: 1, 256, 64>}, {pipeline_mode = #tpu.pipeline_mode<synchronous>, transform_indices = @transform_1, window_bounds = array<i64: 64, 128>}, {pipeline_mode = #tpu.pipeline_mode<synchronous>, transform_indices = @transform_2, window_bounds = array<i64: 1, 128>}, {transform_indices = @transform_3, window_bounds = array<i64: 1, 256, 128>}]} {
    %c0 = arith.constant 0 : index
    %c0_0 = arith.constant 0 : index
    %c0_1 = arith.constant 0 : index
    %0 = vector.load %arg2[%c0, %c0_0, %c0_1] : memref<1x256x64xf32, #tpu.memory_space<vmem>>, vector<1x256x64xf32>
    %1 = vector.shape_cast %0 : vector<1x256x64xf32> to vector<256x64xf32>
    %c0_2 = arith.constant 0 : index
    %c0_3 = arith.constant 0 : index
    %2 = vector.load %arg3[%c0_2, %c0_3] : memref<64x128xf32, #tpu.memory_space<vmem>>, vector<64x128xf32>
    %cst = arith.constant dense<0.000000e+00> : vector<256x128xf32>
    %3 = tpu.matmul %1, %2, %cst {dimension_numbers = #tpu.dot_dimension_numbers<[1], [0], [0], [1], [0, 0, 1, 1], [], []>} : vector<256x64xf32>, vector<64x128xf32>, vector<256x128xf32> -> vector<256x128xf32>
    %c0_4 = arith.constant 0 : index
    %c0_5 = arith.constant 0 : index
    %4 = vector.load %arg4[%c0_4, %c0_5] : memref<1x128xf32, #tpu.memory_space<vmem>>, vector<1x128xf32>
    %5 = vector.broadcast %4 : vector<1x128xf32> to vector<256x128xf32>
    %6 = arith.addf %3, %5 : vector<256x128xf32>
    %cst_6 = arith.constant 0.000000e+00 : f32
    %7 = vector.broadcast %cst_6 : f32 to vector<256x128xf32>
    %8 = arith.cmpf oge, %6, %7 : vector<256x128xf32>
    %cst_7 = arith.constant 1.000000e-01 : f32
    %9 = vector.broadcast %cst_7 : f32 to vector<256x128xf32>
    %10 = arith.mulf %9, %6 : vector<256x128xf32>
    %11 = arith.select %8, %6, %10 : vector<256x128xi1>, vector<256x128xf32>
    %c0_8 = arith.constant 0 : index
    %c0_9 = arith.constant 0 : index
    %c0_10 = arith.constant 0 : index
    %12 = vector.load %arg5[%c0_8, %c0_9, %c0_10] : memref<1x256x128xf32, #tpu.memory_space<vmem>>, vector<1x256x128xf32>
    %13 = vector.shape_cast %12 : vector<1x256x128xf32> to vector<256x128xf32>
    %14 = vector.shape_cast %11 : vector<256x128xf32> to vector<1x256x128xf32>
    tpu.vector_store %arg5[%c0_8, %c0_9, %c0_10], %14 {strides = array<i32>} : memref<1x256x128xf32, #tpu.memory_space<vmem>>, vector<1x256x128xf32>,
    return
  }
  func.func @transform_0(%arg0: i32, %arg1: i32) -> (i32, i32, i32) {
    %c0_i32 = arith.constant 0 : i32
    %c0_i32_0 = arith.constant 0 : i32
    return %arg0, %arg1, %c0_i32 : i32, i32, i32
  }
  func.func @transform_1(%arg0: i32, %arg1: i32) -> (i32, i32) {
    %c0_i32 = arith.constant 0 : i32
    %c0_i32_0 = arith.constant 0 : i32
    %c0_i32_1 = arith.constant 0 : i32
    return %c0_i32, %c0_i32_0 : i32, i32
  }
  func.func @transform_2(%arg0: i32, %arg1: i32) -> (i32, i32) {
    %c0_i32 = arith.constant 0 : i32
    %c0_i32_0 = arith.constant 0 : i32
    %c0_i32_1 = arith.constant 0 : i32
    return %c0_i32, %c0_i32_0 : i32, i32
  }
  func.func @transform_3(%arg0: i32, %arg1: i32) -> (i32, i32, i32) {
    %c0_i32 = arith.constant 0 : i32
    %c0_i32_0 = arith.constant 0 : i32
    return %arg0, %arg1, %c0_i32 : i32, i32, i32
  }
}

</mosaic_0001>

<bundles_post_ra>
// kernel: tpu_custom_call.1
= control target key start
LH: loop header
LB: loop body
LE: loop exit
PB: predicated region body
PF: predicated region fallthrough
CT: control target
= control target key end

     0   :  { %8 = vsyncpa [#allocation3], 0  ;;  %s1398_s0 = inlined_call_operand.vmem [shape: f32[2,256,64], index: 0, kind: input, shape index: {}]   ;;  %s1399_s1 = inlined_call_operand.vmem [shape: f32[64,128], index: 1, kind: input, shape index: {}]   ;;  %s1400_s2 = inlined_call_operand.vmem [shape: f32[1,128], index: 2, kind: input, shape index: {}]   ;;  %s1401_s3 = inlined_call_operand.hbm [shape: f32[2,256,128], index: 3, kind: output, shape index: {}]  }
   0x1   :  { %10 = vsyncpa [#allocation3 + $0x1], 0  ;;  %s1118_s12 = smov 0   ;;  %s1120_s13 = smov 0  }
   0x2   :  { %s1122_s14 = smov 0   ;;  %s1124_s15 = smov 0  }
   0x3   :  { %s1126_s16 = smov 0   ;;  %s1128_s17 = smov 0  }
   0x4 LB: > { %s792_s18 = sadd.s32 4294967295, %s1093_s17   ;;  %s793_s19 = sadd.s32 4294967294, %s1093_s17   ;;  %s1093_s17 = sphi %s1128_s17, %s16_s17   ;;  %s1089_s16 = sphi %s1126_s16, %s1408_s16   ;;  %s1085_s15 = sphi %s1124_s15, %s1407_s15   ;;  %s1081_s14 = sphi %s1122_s14, %s1406_s14   ;;  %s1077_s13 = sphi %s1120_s13, %s1405_s13   ;;  %s1073_s12 = sphi %s1118_s12, %s1404_s12  }
   0x5   : > { %s28_s20 = sadd.s32 1, %s1089_s16  ;;  %s107_s21 = sadd.s32 1, %s1081_s14 }
   0x6   : > { %p30_p0 = scmp.ge.s32.totalorder %s28_s20, 2  ;;  %p117_p1 = scmp.ne.s32.totalorder %s1081_s14, %s1077_s13 }
   0x7   : > { %p118_p2 = scmp.eq.s32.totalorder %s792_s18, 1  ;;  %p123_p3 = scmp.ne.s32.totalorder %s1077_s13, %s1073_s12 }
   0x8   : > { %s1410_s20 = smov (%p30_p0, %s28_s20), 0  ;;  %p124_p5 = scmp.eq.s32.totalorder %s793_s19, 1 }
   0x9   : > { %p1158_p4 = por %p118_p2, %p117_p1  ;;  %s102_s23 = ssub.s32 %s1089_s16, %s1410_s20 }
   0xa   : > { %p796_p6 = scmp.ge.s32.totalorder %s1093_s17, 1  ;;  %p105_p7 = scmp.eq.s32.totalorder %s102_s23, 0 }
   0xb   : > { %p1165_p8 = por %p124_p5, %p123_p3  ;;  %p161_p9 = scmp.lt.s32.totalorder %s1093_s17, 3 }
   0xc   : > { %s1171_s25 = scalar_select %p105_p7, %s1081_s14, %s107_s21  }
   0xd   : > { %p162_p10 = pnand %p796_p6, %p161_p9 }
   0xe   : > { %p190_p11 = scmp.lt.s32.totalorder (!%p162_p10), %s1085_s15, 1  ;;  %s186_s30 = sand.u32 (!%p162_p10), 1, %s1077_s13  }
   0xf   : > { %165 = sbr.rel (%p162_p10) target bundleno = 281 (0x119), region = 32  ;;  %s797_s6 = sshll.u32 (!%p162_p10), %s186_s30, 8 }
  0x10   : > { %s839_s8 = sshll.u32 (!%p162_p10), %s1085_s15, 12  ;;  %s1095_s21 = smov (!%p162_p10), [#allocation2]  }
  0x11   : > { %s1345_s11 = scalar_lea.hbm (!%p162_p10), %s1401_s3, %s839_s8  ;;  %s1021_s23 = sshll.u32 (!%p162_p10), %s1095_s21, 4  ;;  %s1022_s23 = int_to_ptr.vmem [resolvable:$false] %s1021_s23 }
  0x12   : > { %s1023_s26 = scalar_lea.vmem (!%p162_p10), %s1022_s23, 8192 }
  0x14   : > { %v239_v0 = vld [vmem:[%s1399_s1 + $0x38] sm:$0xff]  ;;  %v238_v1 = vld [vmem:[%s1399_s1 + $0x30] sm:$0xff]  ;;  %v237_v2 = vld [vmem:[%s1399_s1 + $0x28] sm:$0xff]  ;;  %s191_s7 = scalar_select %p190_p11, %s1085_s15, 1  ;;  %vm247_vm0 = vcmask 523264  }
  0x15   : > { %880 = vmatprep.subr.mxu0 %v239_v0  ;;  %944 = vmatprep.subr.mxu1 %v239_v0  ;;  %v236_v3 = vld [vmem:[%s1399_s1 + $0x20] sm:$0xff]  ;;  %v235_v4 = vld [vmem:[%s1399_s1 + $0x18] sm:$0xff]  ;;  %v234_v5 = vld [vmem:[%s1399_s1 + $0x10] sm:$0xff] }
  0x16   : > { %881 = vmatpush3.msra.mxu0 %v239_v0  ;;  %952 = vmatpush3.msra.mxu1 %v239_v0  ;;  %s838_s18 = sshll.u32 %s191_s7, 8  ;;  %v233_v6 = vld [vmem:[%s1399_s1 + $0x8] sm:$0xff]  ;;  %v232_v7 = vld [vmem:[%s1399_s1] sm:$0xff]  ;;  %s1282_s7 = scalar_lea.vmem [#allocation2], %s797_s6 }
  0x17   : > { %882 = vmatprep.subr.mxu0 %v238_v1  ;;  %945 = vmatprep.subr.mxu1 %v238_v1  ;;  %s1199_s27 = scalar_lea.vmem %s1398_s0, %s838_s18  ;;  %v1272_v40 = vld [vmem:[%s1400_s2] ss:$0 sm:$0xff]  ;;  %s713_s9 = sshll.u32 %s1282_s7, 4  ;;  %s1347_s9 = int_to_ptr.vmem [resolvable:$true] %s713_s9 }
  0x18   : > { %883 = vmatpush3.msra.mxu0 %v238_v1  ;;  %953 = vmatpush3.msra.mxu1 %v238_v1  ;;  %v200_v8 = vld [vmem:[%s1199_s27] sm:$0xff]  ;;  %v201_v10 = vld [vmem:[%s1199_s27 + $0x8] sm:$0xff]  ;;  %v202_v12 = vld [vmem:[%s1199_s27 + $0x10] sm:$0xff]  ;;  %s1353_s18 = scalar_lea.sflag [#allocation3], %s186_s30  ;;  %s1017_s19 = scalar_lea.vmem %s1347_s9, 4096 }
  0x19   : > { %884 = vmatprep.subr.mxu0 %v237_v2  ;;  %946 = vmatprep.subr.mxu1 %v237_v2  ;;  %v216_v9 = vld [vmem:[%s1199_s27 + $0x80] sm:$0xff]  ;;  %v217_v11 = vld [vmem:[%s1199_s27 + $0x88] sm:$0xff]  ;;  %v218_v13 = vld [vmem:[%s1199_s27 + $0x90] sm:$0xff]  ;;  %p1018_p12 = scmp.ne.s32.totalorder %s1347_s9, %s1017_s19  ;;  %p1024_p1 = scmp.lt.s32.totalorder %s1347_s9, %s1022_s23 }
  0x1a   : > { %885 = vmatpush3.msra.mxu0 %v237_v2  ;;  %954 = vmatpush3.msra.mxu1 %v237_v2  ;;  %v203_v14 = vld [vmem:[%s1199_s27 + $0x18] sm:$0xff]  ;;  %v204_v16 = vld [vmem:[%s1199_s27 + $0x20] sm:$0xff]  ;;  %v205_v18 = vld [vmem:[%s1199_s27 + $0x28] sm:$0xff]  ;;  %p1025_p2 = scmp.lt.s32.totalorder %s1023_s26, %s1017_s19 }
  0x1b   : > { %886 = vmatprep.subr.mxu0 %v236_v3  ;;  %947 = vmatprep.subr.mxu1 %v236_v3  ;;  %v219_v15 = vld [vmem:[%s1199_s27 + $0x98] sm:$0xff]  ;;  %v220_v17 = vld [vmem:[%s1199_s27 + $0xa0] sm:$0xff]  ;;  %v221_v19 = vld [vmem:[%s1199_s27 + $0xa8] sm:$0xff]  ;;  %p1019_p13 = pnand %p1018_p12, %p1158_p4 }
  0x1c   : > { %887 = vmatpush3.msra.mxu0 %v236_v3  ;;  %955 = vmatpush3.msra.mxu1 %v236_v3  ;;  %v206_v20 = vld [vmem:[%s1199_s27 + $0x30] sm:$0xff]  ;;  %v207_v22 = vld [vmem:[%s1199_s27 + $0x38] sm:$0xff]  ;;  %v208_v24 = vld [vmem:[%s1199_s27 + $0x40] sm:$0xff]  ;;  %p1026_p3 = por %p1025_p2, %p1024_p1 }
  0x1d   : > { %888 = vmatprep.subr.mxu0 %v235_v4  ;;  %948 = vmatprep.subr.mxu1 %v235_v4  ;;  %v222_v21 = vld [vmem:[%s1199_s27 + $0xb0] sm:$0xff]  ;;  %v223_v23 = vld [vmem:[%s1199_s27 + $0xb8] sm:$0xff]  ;;  %v224_v25 = vld [vmem:[%s1199_s27 + $0xc0] sm:$0xff]  ;;  %p1020_p0 = pneg %p1019_p13 }
  0x1e   : > { %889 = vmatpush3.msra.mxu0 %v235_v4  ;;  %956 = vmatpush3.msra.mxu1 %v235_v4  ;;  %v209_v26 = vld [vmem:[%s1199_s27 + $0x48] sm:$0xff]  ;;  %v210_v28 = vld [vmem:[%s1199_s27 + $0x50] sm:$0xff]  ;;  %v211_v30 = vld [vmem:[%s1199_s27 + $0x58] sm:$0xff] }
  0x1f   : > { %890 = vmatprep.subr.mxu0 %v234_v5  ;;  %949 = vmatprep.subr.mxu1 %v234_v5  ;;  %v225_v27 = vld [vmem:[%s1199_s27 + $0xc8] sm:$0xff]  ;;  %v226_v29 = vld [vmem:[%s1199_s27 + $0xd0] sm:$0xff]  ;;  %v227_v31 = vld [vmem:[%s1199_s27 + $0xd8] sm:$0xff]  ;;  %p1027_p5 = pnand %p1026_p3, %p1020_p0 }
  0x20   : > { %891 = vmatpush3.msra.mxu0 %v234_v5  ;;  %957 = vmatpush3.msra.mxu1 %v234_v5  ;;  %v212_v32 = vld [vmem:[%s1199_s27 + $0x60] sm:$0xff]  ;;  %v213_v34 = vld [vmem:[%s1199_s27 + $0x68] sm:$0xff]  ;;  %v214_v36 = vld [vmem:[%s1199_s27 + $0x70] sm:$0xff] }
  0x21   : > { %892 = vmatprep.subr.mxu0 %v233_v6  ;;  %950 = vmatprep.subr.mxu1 %v233_v6  ;;  %v228_v33 = vld [vmem:[%s1199_s27 + $0xe0] sm:$0xff]  ;;  %v229_v35 = vld [vmem:[%s1199_s27 + $0xe8] sm:$0xff]  ;;  %v230_v37 = vld [vmem:[%s1199_s27 + $0xf0] sm:$0xff] }
  0x22   : > { %893 = vmatpush3.msra.mxu0 %v233_v6  ;;  %958 = vmatpush3.msra.mxu1 %v233_v6  ;;  %v215_v38 = vld [vmem:[%s1199_s27 + $0x78] sm:$0xff] }
  0x23   : > { %894 = vmatprep.subr.mxu0 %v232_v7  ;;  %951 = vmatprep.subr.mxu1 %v232_v7  ;;  %v231_v39 = vld [vmem:[%s1199_s27 + $0xf8] sm:$0xff] }
  0x24   : > { %895 = vmatpush3.msra.mxu0 %v232_v7  ;;  %959 = vmatpush3.msra.mxu1 %v232_v7 }
  0x25   : > { %896 = vmatprep.mubr.msk.f32.mxu0 %vm247_vm0, %v200_v8  ;;  %920 = vmatprep.mubr.msk.f32.mxu1 %vm247_vm0, %v216_v9 }
  0x26   : > { %897 = vmatmul.mubr.msk.f32.vlgmr.msra.gmra.mxu0 %vm247_vm0, %v201_v10  ;;  %921 = vmatmul.mubr.msk.f32.vlgmr.msra.gmra.mxu1 %vm247_vm0, %v217_v11 }
  0x27   : > { %899 = vmatprep.mubr.msk.f32.mxu0 %vm247_vm0, %v202_v12  ;;  %923 = vmatprep.mubr.msk.f32.mxu1 %vm247_vm0, %v218_v13 }
  0x2a   : > { %900 = vmatmul.mubr.msk.f32.gmra.mxu0 %vm247_vm0, %v203_v14  ;;  %924 = vmatmul.mubr.msk.f32.gmra.mxu1 %vm247_vm0, %v219_v15 }
  0x2b   : > { %902 = vmatprep.mubr.msk.f32.mxu0 %vm247_vm0, %v204_v16  ;;  %926 = vmatprep.mubr.msk.f32.mxu1 %vm247_vm0, %v220_v17 }
  0x2e   : > { %903 = vmatmul.mubr.msk.f32.gmra.mxu0 %vm247_vm0, %v205_v18  ;;  %927 = vmatmul.mubr.msk.f32.gmra.mxu1 %vm247_vm0, %v221_v19 }
  0x2f   : > { %905 = vmatprep.mubr.msk.f32.mxu0 %vm247_vm0, %v206_v20  ;;  %929 = vmatprep.mubr.msk.f32.mxu1 %vm247_vm0, %v222_v21 }
  0x32   : > { %906 = vmatmul.mubr.msk.f32.gmra.mxu0 %vm247_vm0, %v207_v22  ;;  %930 = vmatmul.mubr.msk.f32.gmra.mxu1 %vm247_vm0, %v223_v23 }
  0x33   : > { %908 = vmatprep.mubr.msk.f32.mxu0 %vm247_vm0, %v208_v24  ;;  %932 = vmatprep.mubr.msk.f32.mxu1 %vm247_vm0, %v224_v25 }
  0x36   : > { %909 = vmatmul.mubr.msk.f32.gmra.mxu0 %vm247_vm0, %v209_v26  ;;  %933 = vmatmul.mubr.msk.f32.gmra.mxu1 %vm247_vm0, %v225_v27 }
  0x37   : > { %911 = vmatprep.mubr.msk.f32.mxu0 %vm247_vm0, %v210_v28  ;;  %935 = vmatprep.mubr.msk.f32.mxu1 %vm247_vm0, %v226_v29 }
  0x3a   : > { %912 = vmatmul.mubr.msk.f32.gmra.mxu0 %vm247_vm0, %v211_v30  ;;  %936 = vmatmul.mubr.msk.f32.gmra.mxu1 %vm247_vm0, %v227_v31 }
  0x3b   : > { %914 = vmatprep.mubr.msk.f32.mxu0 %vm247_vm0, %v212_v32  ;;  %938 = vmatprep.mubr.msk.f32.mxu1 %vm247_vm0, %v228_v33 }
  0x3e   : > { %915 = vmatmul.mubr.msk.f32.gmra.mxu0 %vm247_vm0, %v213_v34  ;;  %939 = vmatmul.mubr.msk.f32.gmra.mxu1 %vm247_vm0, %v229_v35 }
  0x3f   : > { %917 = vmatprep.mubr.msk.f32.mxu0 %vm247_vm0, %v214_v36  ;;  %941 = vmatprep.mubr.msk.f32.mxu1 %vm247_vm0, %v230_v37 }
  0x42   : > { %918 = vmatmul.mubr.msk.f32.gmra.mxu0 %vm247_vm0, %v215_v38  ;;  %942 = vmatmul.mubr.msk.f32.gmra.mxu1 %vm247_vm0, %v231_v39 }
  0xe6   : > { %v898_v41 = vpop.f32.mrf.mxu0  ;;  %v922_v42 = vpop.f32.mrf.mxu1 }
  0xe7   : > { %v416_v43 = vadd.f32 %v898_v41, %v1272_v40  ;;  %v496_v44 = vadd.f32 %v922_v42, %v1272_v40 }
  0xe8   : > { %v410_v45 = vpop.f32.mrf.mxu0  ;;  %v490_v46 = vpop.f32.mrf.mxu1 }
  0xe9   : > { %vm570_vm1 = vcmp.ge.f32.partialorder %v416_v43, 0.0  ;;  %v602_v47 = vmul.f32 0.1, %v416_v43  ;;  %vm586_vm2 = vcmp.ge.f32.partialorder %v496_v44, 0.0  ;;  %v618_v48 = vmul.f32 0.1, %v496_v44 }
  0xea   : > { %v411_v49 = vadd.f32 %v1272_v40, %v410_v45  ;;  %v491_v50 = vadd.f32 %v1272_v40, %v490_v46  ;;  %v901_v51 = vpop.f32.mrf.mxu0  ;;  %v925_v52 = vpop.f32.mrf.mxu1 }
  0xeb   : > { %v634_v53 = vsel %vm570_vm1, %v416_v43, %v602_v47  ;;  %v650_v54 = vsel %vm586_vm2, %v496_v44, %v618_v48  ;;  %v426_v55 = vadd.f32 %v901_v51, %v1272_v40  ;;  %v506_v56 = vadd.f32 %v925_v52, %v1272_v40 }
  0xec   : > { %666 = vst [vmem:[%s1282_s7 + $0x8] sm:$0xff] %v634_v53  ;;  %682 = vst [vmem:[%s1282_s7 + $0x88] sm:$0xff] %v650_v54  ;;  %vm569_vm3 = vcmp.ge.f32.partialorder %v411_v49, 0.0  ;;  %v601_v57 = vmul.f32 0.1, %v411_v49  ;;  %vm585_vm4 = vcmp.ge.f32.partialorder %v491_v50, 0.0  ;;  %v420_v59 = vpop.f32.mrf.mxu0  ;;  %v500_v60 = vpop.f32.mrf.mxu1 }
  0xed   : > { %v617_v58 = vmul.f32 0.1, %v491_v50  ;;  %vm572_vm5 = vcmp.ge.f32.partialorder %v426_v55, 0.0  ;;  %v604_v61 = vmul.f32 0.1, %v426_v55  ;;  %vm588_vm6 = vcmp.ge.f32.partialorder %v506_v56, 0.0 }
  0xee   : > { %v620_v62 = vmul.f32 0.1, %v506_v56  ;;  %v633_v63 = vsel %vm569_vm3, %v411_v49, %v601_v57  ;;  %v421_v1 = vadd.f32 %v1272_v40, %v420_v59  ;;  %v501_v2 = vadd.f32 %v1272_v40, %v500_v60  ;;  %v904_v3 = vpop.f32.mrf.mxu0  ;;  %v928_v4 = vpop.f32.mrf.mxu1 }
  0xef   : > { %v649_v0 = vsel %vm585_vm4, %v491_v50, %v617_v58  ;;  %665 = vst [vmem:[%s1282_s7] sm:$0xff] %v633_v63  ;;  %v636_v5 = vsel %vm572_vm5, %v426_v55, %v604_v61  ;;  %v436_v7 = vadd.f32 %v904_v3, %v1272_v40  ;;  %v516_v8 = vadd.f32 %v928_v4, %v1272_v40 }
  0xf0   : > { %681 = vst [vmem:[%s1282_s7 + $0x80] sm:$0xff] %v649_v0  ;;  %v652_v6 = vsel %vm588_vm6, %v506_v56, %v620_v62  ;;  %668 = vst [vmem:[%s1282_s7 + $0x18] sm:$0xff] %v636_v5  ;;  %vm571_vm7 = vcmp.ge.f32.partialorder %v421_v1, 0.0  ;;  %v603_v9 = vmul.f32 0.1, %v421_v1  ;;  %vm587_vm8 = vcmp.ge.f32.partialorder %v501_v2, 0.0  ;;  %v430_v11 = vpop.f32.mrf.mxu0  ;;  %v510_v12 = vpop.f32.mrf.mxu1 }
  0xf1   : > { %684 = vst [vmem:[%s1282_s7 + $0x98] sm:$0xff] %v652_v6  ;;  %v619_v10 = vmul.f32 0.1, %v501_v2  ;;  %vm574_vm9 = vcmp.ge.f32.partialorder %v436_v7, 0.0  ;;  %v606_v13 = vmul.f32 0.1, %v436_v7  ;;  %v431_v17 = vadd.f32 %v1272_v40, %v430_v11 }
  0xf2   : > { %vm590_vm10 = vcmp.ge.f32.partialorder %v516_v8, 0.0  ;;  %v622_v14 = vmul.f32 0.1, %v516_v8  ;;  %v635_v15 = vsel %vm571_vm7, %v421_v1, %v603_v9  ;;  %v511_v18 = vadd.f32 %v1272_v40, %v510_v12  ;;  %v907_v19 = vpop.f32.mrf.mxu0  ;;  %v931_v20 = vpop.f32.mrf.mxu1 }
  0xf3   : > { %v651_v16 = vsel %vm587_vm8, %v501_v2, %v619_v10  ;;  %667 = vst [vmem:[%s1282_s7 + $0x10] sm:$0xff] %v635_v15  ;;  %v638_v21 = vsel %vm574_vm9, %v436_v7, %v606_v13  ;;  %v446_v23 = vadd.f32 %v907_v19, %v1272_v40  ;;  %v526_v24 = vadd.f32 %v931_v20, %v1272_v40 }
  0xf4   : > { %683 = vst [vmem:[%s1282_s7 + $0x90] sm:$0xff] %v651_v16  ;;  %v654_v22 = vsel %vm590_vm10, %v516_v8, %v622_v14  ;;  %670 = vst [vmem:[%s1282_s7 + $0x28] sm:$0xff] %v638_v21  ;;  %vm573_vm11 = vcmp.ge.f32.partialorder %v431_v17, 0.0  ;;  %v605_v25 = vmul.f32 0.1, %v431_v17  ;;  %vm589_vm12 = vcmp.ge.f32.partialorder %v511_v18, 0.0  ;;  %v440_v27 = vpop.f32.mrf.mxu0  ;;  %v520_v28 = vpop.f32.mrf.mxu1 }
  0xf5   : > { %686 = vst [vmem:[%s1282_s7 + $0xa8] sm:$0xff] %v654_v22  ;;  %v621_v26 = vmul.f32 0.1, %v511_v18  ;;  %vm576_vm13 = vcmp.ge.f32.partialorder %v446_v23, 0.0  ;;  %v608_v29 = vmul.f32 0.1, %v446_v23  ;;  %v441_v33 = vadd.f32 %v1272_v40, %v440_v27 }
  0xf6   : > { %vm592_vm14 = vcmp.ge.f32.partialorder %v526_v24, 0.0  ;;  %v624_v30 = vmul.f32 0.1, %v526_v24  ;;  %v637_v31 = vsel %vm573_vm11, %v431_v17, %v605_v25  ;;  %v521_v34 = vadd.f32 %v1272_v40, %v520_v28  ;;  %v910_v35 = vpop.f32.mrf.mxu0  ;;  %v934_v36 = vpop.f32.mrf.mxu1 }
  0xf7   : > { %v653_v32 = vsel %vm589_vm12, %v511_v18, %v621_v26  ;;  %669 = vst [vmem:[%s1282_s7 + $0x20] sm:$0xff] %v637_v31  ;;  %v640_v37 = vsel %vm576_vm13, %v446_v23, %v608_v29  ;;  %v456_v39 = vadd.f32 %v910_v35, %v1272_v40  ;;  %v536_v41 = vadd.f32 %v934_v36, %v1272_v40 }
  0xf8   : > { %685 = vst [vmem:[%s1282_s7 + $0xa0] sm:$0xff] %v653_v32  ;;  %v656_v38 = vsel %vm592_vm14, %v526_v24, %v624_v30  ;;  %672 = vst [vmem:[%s1282_s7 + $0x38] sm:$0xff] %v640_v37  ;;  %vm575_vm15 = vcmp.ge.f32.partialorder %v441_v33, 0.0  ;;  %v607_v42 = vmul.f32 0.1, %v441_v33  ;;  %vm591_vm0 = vcmp.ge.f32.partialorder %v521_v34, 0.0  ;;  %v450_v44 = vpop.f32.mrf.mxu0  ;;  %v530_v45 = vpop.f32.mrf.mxu1 }
  0xf9   : > { %688 = vst [vmem:[%s1282_s7 + $0xb8] sm:$0xff] %v656_v38  ;;  %v623_v43 = vmul.f32 0.1, %v521_v34  ;;  %vm578_vm1 = vcmp.ge.f32.partialorder %v456_v39, 0.0  ;;  %v610_v46 = vmul.f32 0.1, %v456_v39  ;;  %v451_v50 = vadd.f32 %v1272_v40, %v450_v44 }
  0xfa   : > { %vm594_vm2 = vcmp.ge.f32.partialorder %v536_v41, 0.0  ;;  %v626_v47 = vmul.f32 0.1, %v536_v41  ;;  %v639_v48 = vsel %vm575_vm15, %v441_v33, %v607_v42  ;;  %v531_v51 = vadd.f32 %v1272_v40, %v530_v45  ;;  %v913_v52 = vpop.f32.mrf.mxu0  ;;  %v937_v53 = vpop.f32.mrf.mxu1 }
  0xfb   : > { %v655_v49 = vsel %vm591_vm0, %v521_v34, %v623_v43  ;;  %671 = vst [vmem:[%s1282_s7 + $0x30] sm:$0xff] %v639_v48  ;;  %v642_v54 = vsel %vm578_vm1, %v456_v39, %v610_v46  ;;  %v466_v56 = vadd.f32 %v913_v52, %v1272_v40  ;;  %v546_v57 = vadd.f32 %v937_v53, %v1272_v40 }
  0xfc   : > { %687 = vst [vmem:[%s1282_s7 + $0xb0] sm:$0xff] %v655_v49  ;;  %v658_v55 = vsel %vm594_vm2, %v536_v41, %v626_v47  ;;  %674 = vst [vmem:[%s1282_s7 + $0x48] sm:$0xff] %v642_v54  ;;  %vm577_vm3 = vcmp.ge.f32.partialorder %v451_v50, 0.0  ;;  %v609_v58 = vmul.f32 0.1, %v451_v50  ;;  %vm593_vm4 = vcmp.ge.f32.partialorder %v531_v51, 0.0  ;;  %v460_v60 = vpop.f32.mrf.mxu0  ;;  %v540_v61 = vpop.f32.mrf.mxu1 }
  0xfd   : > { %690 = vst [vmem:[%s1282_s7 + $0xc8] sm:$0xff] %v658_v55  ;;  %v625_v59 = vmul.f32 0.1, %v531_v51  ;;  %vm580_vm5 = vcmp.ge.f32.partialorder %v466_v56, 0.0  ;;  %v612_v62 = vmul.f32 0.1, %v466_v56  ;;  %v461_v2 = vadd.f32 %v1272_v40, %v460_v60 }
  0xfe   : > { %vm596_vm6 = vcmp.ge.f32.partialorder %v546_v57, 0.0  ;;  %v628_v63 = vmul.f32 0.1, %v546_v57  ;;  %v641_v0 = vsel %vm577_vm3, %v451_v50, %v609_v58  ;;  %v541_v3 = vadd.f32 %v1272_v40, %v540_v61  ;;  %v916_v4 = vpop.f32.mrf.mxu0  ;;  %v940_v5 = vpop.f32.mrf.mxu1 }
  0xff   : > { %v657_v1 = vsel %vm593_vm4, %v531_v51, %v625_v59  ;;  %673 = vst [vmem:[%s1282_s7 + $0x40] sm:$0xff] %v641_v0  ;;  %v644_v6 = vsel %vm580_vm5, %v466_v56, %v612_v62  ;;  %v476_v8 = vadd.f32 %v916_v4, %v1272_v40  ;;  %v556_v9 = vadd.f32 %v940_v5, %v1272_v40 }
 0x100   : > { %689 = vst [vmem:[%s1282_s7 + $0xc0] sm:$0xff] %v657_v1  ;;  %v660_v7 = vsel %vm596_vm6, %v546_v57, %v628_v63  ;;  %676 = vst [vmem:[%s1282_s7 + $0x58] sm:$0xff] %v644_v6  ;;  %vm579_vm7 = vcmp.ge.f32.partialorder %v461_v2, 0.0  ;;  %v611_v10 = vmul.f32 0.1, %v461_v2  ;;  %vm595_vm8 = vcmp.ge.f32.partialorder %v541_v3, 0.0  ;;  %v470_v12 = vpop.f32.mrf.mxu0  ;;  %v550_v13 = vpop.f32.mrf.mxu1 }
 0x101   : > { %692 = vst [vmem:[%s1282_s7 + $0xd8] sm:$0xff] %v660_v7  ;;  %v627_v11 = vmul.f32 0.1, %v541_v3  ;;  %vm582_vm9 = vcmp.ge.f32.partialorder %v476_v8, 0.0  ;;  %v614_v14 = vmul.f32 0.1, %v476_v8  ;;  %v471_v18 = vadd.f32 %v1272_v40, %v470_v12 }
 0x102   : > { %vm598_vm10 = vcmp.ge.f32.partialorder %v556_v9, 0.0  ;;  %v630_v15 = vmul.f32 0.1, %v556_v9  ;;  %v643_v16 = vsel %vm579_vm7, %v461_v2, %v611_v10  ;;  %v551_v19 = vadd.f32 %v1272_v40, %v550_v13  ;;  %v919_v20 = vpop.f32.mrf.mxu0  ;;  %v943_v21 = vpop.f32.mrf.mxu1 }
 0x103   : > { %v659_v17 = vsel %vm595_vm8, %v541_v3, %v627_v11  ;;  %675 = vst [vmem:[%s1282_s7 + $0x50] sm:$0xff] %v643_v16  ;;  %v646_v22 = vsel %vm582_vm9, %v476_v8, %v614_v14  ;;  %v486_v24 = vadd.f32 %v919_v20, %v1272_v40  ;;  %v566_v25 = vadd.f32 %v943_v21, %v1272_v40 }
 0x104   : > { %691 = vst [vmem:[%s1282_s7 + $0xd0] sm:$0xff] %v659_v17  ;;  %v662_v23 = vsel %vm598_vm10, %v556_v9, %v630_v15  ;;  %678 = vst [vmem:[%s1282_s7 + $0x68] sm:$0xff] %v646_v22  ;;  %vm581_vm11 = vcmp.ge.f32.partialorder %v471_v18, 0.0  ;;  %v613_v26 = vmul.f32 0.1, %v471_v18  ;;  %vm597_vm12 = vcmp.ge.f32.partialorder %v551_v19, 0.0  ;;  %v480_v28 = vpop.f32.mrf.mxu0  ;;  %v560_v29 = vpop.f32.mrf.mxu1 }
 0x105   : > { %694 = vst [vmem:[%s1282_s7 + $0xe8] sm:$0xff] %v662_v23  ;;  %v629_v27 = vmul.f32 0.1, %v551_v19  ;;  %vm584_vm13 = vcmp.ge.f32.partialorder %v486_v24, 0.0  ;;  %v616_v30 = vmul.f32 0.1, %v486_v24  ;;  %v481_v34 = vadd.f32 %v1272_v40, %v480_v28 }
 0x106   : > { %vm600_vm14 = vcmp.ge.f32.partialorder %v566_v25, 0.0  ;;  %v632_v31 = vmul.f32 0.1, %v566_v25  ;;  %v645_v32 = vsel %vm581_vm11, %v471_v18, %v613_v26  ;;  %v561_v35 = vadd.f32 %v1272_v40, %v560_v29 }
 0x107   : > { %v661_v33 = vsel %vm597_vm12, %v551_v19, %v629_v27  ;;  %677 = vst [vmem:[%s1282_s7 + $0x60] sm:$0xff] %v645_v32  ;;  %v648_v36 = vsel %vm584_vm13, %v486_v24, %v616_v30  ;;  %vm583_vm15 = vcmp.ge.f32.partialorder %v481_v34, 0.0  ;;  %v615_v38 = vmul.f32 0.1, %v481_v34 }
 0x108   : > { %693 = vst [vmem:[%s1282_s7 + $0xe0] sm:$0xff] %v661_v33  ;;  %v664_v37 = vsel %vm600_vm14, %v566_v25, %v632_v31  ;;  %680 = vst [vmem:[%s1282_s7 + $0x78] sm:$0xff] %v648_v36  ;;  %vm599_vm0 = vcmp.ge.f32.partialorder %v561_v35, 0.0  ;;  %v631_v39 = vmul.f32 0.1, %v561_v35 }
 0x109   : > { %696 = vst [vmem:[%s1282_s7 + $0xf8] sm:$0xff] %v664_v37  ;;  %v647_v40 = vsel %vm583_vm15, %v481_v34, %v615_v38 }
 0x10a   : > { %v663_v41 = vsel %vm599_vm0, %v561_v35, %v631_v39  ;;  %679 = vst [vmem:[%s1282_s7 + $0x70] sm:$0xff] %v647_v40 }
 0x10b   : > { %695 = vst [vmem:[%s1282_s7 + $0xf0] sm:$0xff] %v663_v41 }
 0x10c   : > { %1030 = shalt.err (!%p1027_p5)
}
 0x10d   : > { %s1031_s27 = scalar_lea.hbm %s1345_s11, 4096  ;;  %s1035_s30 = scalar_lea.hbm %s1401_s3, 8192 }
 0x10e   : > { %p1032_p6 = scmp.ne.s32.totalorder %s1345_s11, %s1031_s27  ;;  %p1036_p10 = scmp.lt.s32.totalorder %s1345_s11, %s1401_s3 }
 0x10f   : > { %p1037_p11 = scmp.lt.s32.totalorder %s1035_s30, %s1031_s27 }
 0x110   : > { %p1033_p7 = pnand %p1032_p6, %p1158_p4 }
 0x111   : > { %p1038_p12 = por %p1037_p11, %p1036_p10 }
 0x112   : > { %p1034_p9 = pneg %p1033_p7 }
 0x114   : > { %p1039_p13 = pnand %p1038_p12, %p1034_p9 }
 0x116   : > { %1042 = shalt.err (!%p1039_p13)
}
 0x117   : > { %s1096_s6 = smov 128   ;;  %s1097_s7 = smov 8  }
 0x118   : > { %960 = dma.vmem_to_hbm [thread:$0]  (%p1158_p4), %s1347_s9, 4096, %s1345_s11, %s1353_s18, %s1096_s6, %s1096_s6, %s1097_s7  }
 0x119 PF: > { %p966_p0 = scmp.ge.s32.totalorder %s1093_s17, 2  ;;  %s728_s8 = sand.u32 1, %s1073_s12  }
 0x11a   : > { %s729_s15 = scalar_lea.sflag [#allocation3], %s728_s8 }
 0x11b   : > { %p963_p1 = pnand %p966_p0, %p1165_p8 }
 0x11d   : > { %p964_p2 = pneg %p963_p1 }
 0x11f   : > { %1068 = dma.done.wait (%p964_p2), %s729_s15, 4096  }
 0x120   : > { %1070 = vsyncadd (%p964_p2), %s729_s15, 4294963200  ;;  %s16_s17 = sadd.s32 1, %s1093_s17   ;;  %s1404_s12 = smov %s1077_s13 }
 0x121   : > { %p13_p3 = scmp.ge.s32.totalorder %s16_s17, 4   ;;  %s1405_s13 = smov %s1081_s14 }
 0x122   : > { %s1406_s14 = smov %s1171_s25  ;;  %s1407_s15 = smov %s1089_s16 }
 0x123   : > { %s1408_s16 = smov %s1410_s20  ;;  %15 = sbr.rel (!%p13_p3) target bundleno = 4 (0x4), region = 67 }
 0x128   :  { %734 = vsyncpa [#allocation3], 1 }
 0x129   :  { %736 = vsyncpa [#allocation3 + $0x1], 1 }

</bundles_post_ra>
